<compile_context>
chip_gen: v6e
topology: v6e:2x2x1
jax: 0.10.0
libtpu: 0.0.40
codegen_flags: <defaults>
</compile_context>

<pallas_src>
import functools

import jax
import jax.numpy as jnp
from jax.experimental import pallas as pl
from jax.experimental.pallas import tpu as pltpu


# ----------------------------------------------------------------------------
# Glue: bilinear interpolation matching F.interpolate(mode='bilinear',
# align_corners=False). Batch-invariant parameter preprocessing, not hot path.
# ----------------------------------------------------------------------------
def bilinear_resize(img, out_h, out_w):
    in_h, in_w = img.shape

    def src_idx(out_size, in_size):
        scale = in_size / out_size
        src = (jnp.arange(out_size, dtype=jnp.float32) + 0.5) * scale - 0.5
        src = jnp.clip(src, 0.0, None)
        i0 = jnp.minimum(jnp.floor(src).astype(jnp.int32), in_size - 1)
        i1 = jnp.minimum(i0 + 1, in_size - 1)
        frac = src - i0.astype(jnp.float32)
        return i0, i1, frac

    y0, y1, fy = src_idx(out_h, in_h)
    x0, x1, fx = src_idx(out_w, in_w)
    top = img[y0][:, x0] * (1.0 - fx)[None, :] + img[y0][:, x1] * fx[None, :]
    bot = img[y1][:, x0] * (1.0 - fx)[None, :] + img[y1][:, x1] * fx[None, :]
    return top * (1.0 - fy)[:, None] + bot * fy[:, None]


# ----------------------------------------------------------------------------
# Pallas kernel: `bb` batch elements per grid step ("parallel" -> megacore).
# All heavy ops are fused MXU matmuls; elementwise math stays f32.
# ----------------------------------------------------------------------------
def aft_kernel(x_ref, wqkv_ref, bqkv_ref, wexp_ref, wout_ref, bout_ref, o_ref,
               *, mxu_dtype):
    D = wout_ref.shape[0]
    bb, T, _ = x_ref.shape

    # [bb, T, D] -> [bb*T, D]: leading-dim merge only (no lane movement).
    x = x_ref[...].reshape(bb * T, D)

    # Fused QKV projection: one tall [bb*T, D] @ [D, 3D] matmul, f32 acc.
    qkv = jnp.dot(x.astype(mxu_dtype), wqkv_ref[...],
                  preferred_element_type=jnp.float32) + bqkv_ref[...]  # [bb*T,3D]
    q = qkv[:, :D]
    k = qkv[:, D:2 * D]
    v = qkv[:, 2 * D:]

    # Stabilized exp(k): the per-feature max (a constant per column) scales
    # num and den identically, so it cancels exactly.
    kmax = jnp.max(k, axis=0, keepdims=True)                          # [1, D]
    ek = jnp.exp(k - kmax)                                            # [bb*T, D]

    # Fused numerator/denominator: per batch element one [T,T] @ [T,2D] matmul
    # on the concatenated [ek*v | ek] operand; static unroll over bb.
    mix = jnp.concatenate([ek * v, ek], axis=-1).astype(mxu_dtype)    # [bb*T,2D]
    wexp = wexp_ref[...]
    nd = jnp.concatenate(
        [jnp.dot(wexp, mix[b * T:(b + 1) * T, :],
                 preferred_element_type=jnp.float32) for b in range(bb)],
        axis=0)                                                       # [bb*T,2D]
    num = nd[:, :D]
    den = nd[:, D:]

    gated = jax.nn.sigmoid(q) * num * pl.reciprocal(den, approx=True)  # [bb*T,D]

    out = jnp.dot(gated.astype(mxu_dtype), wout_ref[...],
                  preferred_element_type=jnp.float32) + bout_ref[...]
    o_ref[...] = out.reshape(bb, T, D).astype(o_ref.dtype)


# ----------------------------------------------------------------------------
# VMEM sizing / batch-block selection.
# ----------------------------------------------------------------------------
def _vmem_estimate(bb, T, D, wsize):
    f32 = 4
    weights = (D * 3 * D * wsize + 3 * D * f32 + T * T * wsize
               + D * D * wsize + D * f32)
    io = 2 * bb * T * D * f32                       # x block + out block
    interm = bb * T * D * (14 * f32 + 6 * wsize)    # qkv/ek/mix/nd/gated + casts
    return 2 * (io + weights) + interm              # x2: double-buffered pipeline


def _pick_block_batch(B, T, D, wsize, budget, cap=8):
    best = 1
    for bb in range(1, min(B, cap) + 1):
        if B % bb == 0 and _vmem_estimate(bb, T, D, wsize) <= budget:
            best = bb
    return best


def aft_forward(data, params, *, mxu_dtype=jnp.float32):
    """data: [T, B, D] (PyTorch layout). Returns [T, B, D].

    mxu_dtype: dtype of the MXU operands (weights, pos matrix, dot inputs).
    jnp.float32 reproduces torch numerics; jnp.bfloat16 targets v6e/v7x MXU
    throughput while keeping f32 accumulation and f32 elementwise math.
    """
    T, B, D = data.shape
    wsize = jnp.dtype(mxu_dtype).itemsize

    # Fused projection weight / packed bias (torch Linear weight is [out, in]).
    w_qkv = params["w_qkv"].T.astype(mxu_dtype)                      # [D, 3D]
    b_qkv = params["b_qkv"].reshape(1, 3 * D).astype(jnp.float32)    # [1, 3D]
    w_out = params["w_out"].T.astype(mxu_dtype)                      # [D, D]
    b_out = params["b_out"].reshape(1, D).astype(jnp.float32)        # [1, D]

    # Batch-invariant: interpolate + exp once in the wrapper (not per grid
    # step). Row-max subtraction cancels in num/den but keeps exp bounded.
    pos = bilinear_resize(params["pos_bias"][0, 0].astype(jnp.float32), T, T)
    pos = pos - jnp.max(pos, axis=-1, keepdims=True)
    w_exp = jnp.exp(pos).astype(mxu_dtype)                           # [T, T]

    x = jnp.transpose(data, (1, 0, 2)).astype(jnp.float32)           # [B, T, D]

    bb = _pick_block_batch(B, T, D, wsize, budget=40 << 20)
    vmem_bytes = int(min(max(_vmem_estimate(bb, T, D, wsize) + (4 << 20),
                             16 << 20), 64 << 20))

    kernel = functools.partial(aft_kernel, mxu_dtype=mxu_dtype)

    def const(shape):
        # Constant index map: fetched once, kept resident across the grid.
        return pl.BlockSpec(shape, lambda b: (0,) * len(shape))

    out = pl.pallas_call(
        kernel,
        out_shape=jax.ShapeDtypeStruct((B, T, D), jnp.float32),
        grid=(B // bb,),
        in_specs=[
            pl.BlockSpec((bb, T, D), lambda b: (b, 0, 0)),  # x (batch tile)
            const((D, 3 * D)),                              # fused W_qkv
            const((1, 3 * D)),                              # packed qkv bias
            const((T, T)),                                  # exp(pos bias)
            const((D, D)),                                  # W_out
            const((1, D)),                                  # output bias
        ],
        out_specs=pl.BlockSpec((bb, T, D), lambda b: (b, 0, 0)),
        compiler_params=pltpu.CompilerParams(
            dimension_semantics=("parallel",),
            vmem_limit_bytes=vmem_bytes),
    )(x, w_qkv, b_qkv, w_exp, w_out, b_out)

    return jnp.transpose(out, (1, 0, 2))                             # [T, B, D]


# ----------------------------------------------------------------------------
# Pure-JAX reference (direct translation of the PyTorch forward).
# ----------------------------------------------------------------------------
def aft_reference(data, params):
    T, _, D = data.shape
    qkv = data @ params["w_qkv"].T + params["b_qkv"]
    q, k, v = qkv[..., :D], qkv[..., D:2 * D], qkv[..., 2 * D:]
    w = jnp.exp(bilinear_resize(params["pos_bias"][0, 0], T, T))
    ek = jnp.exp(k)
    num = jnp.einsum("ij,jbd->ibd", w, ek * v)
    den = jnp.einsum("ij,jbd->ibd", w, ek)
    out = jax.nn.sigmoid(q) * (num / den)
    return out @ params["w_out"].T + params["b_out"]


if __name__ == "__main__":
    T, B, D = 8, 2, 32        # seq_len, batch, d_model

    key = jax.random.PRNGKey(0)
    ks = jax.random.split(key, 6)
    data = jax.random.normal(ks[0], (T, B, D), dtype=jnp.float32)

    params = {
        "w_qkv": 0.1 * jax.random.normal(ks[1], (3 * D, D), dtype=jnp.float32),
        "b_qkv": 0.1 * jax.random.normal(ks[2], (3 * D,), dtype=jnp.float32),
        "w_out": 0.1 * jax.random.normal(ks[3], (D, D), dtype=jnp.float32),
        "b_out": 0.1 * jax.random.normal(ks[4], (D,), dtype=jnp.float32),
        # nn.Parameter(zeros(1,1,seq_len,seq_len)); small random values so the
        # exp / interpolation path is actually exercised.
        "pos_bias": 0.1 * jax.random.normal(ks[5], (1, 1, T, T), dtype=jnp.float32),
    }

    ref = aft_reference(data, params)

    # f32 MXU operands: matches torch numerics.
    out_f32 = jax.block_until_ready(aft_forward(data, params))
    assert out_f32.shape == (T, B, D), out_f32.shape
    assert jnp.allclose(out_f32, ref, rtol=1e-2, atol=1e-2), (
        "f32 mismatch vs reference", float(jnp.max(jnp.abs(out_f32 - ref))))

    # bf16 MXU operands (v6e/v7x fast path), f32 accumulation/elementwise.
    out_bf16 = jax.block_until_ready(
        aft_forward(data, params, mxu_dtype=jnp.bfloat16))
    assert jnp.allclose(out_bf16, ref, rtol=5e-2, atol=5e-2), (
        "bf16 mismatch vs reference", float(jnp.max(jnp.abs(out_bf16 - ref))))

    print("KERNEL_OK")
</pallas_src>

<mosaic_0001>
module attributes {stable_mosaic.version = 11 : i64} {
  func.func @aft_kernel(%arg0: i32, %arg1: memref<2x8x32xf32, #tpu.memory_space<vmem>>, %arg2: memref<32x96xf32, #tpu.memory_space<vmem>>, %arg3: memref<1x96xf32, #tpu.memory_space<vmem>>, %arg4: memref<8x8xf32, #tpu.memory_space<vmem>>, %arg5: memref<32x32xf32, #tpu.memory_space<vmem>>, %arg6: memref<1x32xf32, #tpu.memory_space<vmem>>, %arg7: memref<2x8x32xf32, #tpu.memory_space<vmem>>) attributes {dimension_semantics = [#tpu.dimension_semantics<parallel>], iteration_bounds = array<i64: 1>, scalar_prefetch = 0 : i64, scratch_operands = 0 : i64, tpu.core_type = #tpu.core_type<tc>, window_params = [{transform_indices = @transform_0, window_bounds = array<i64: 2, 8, 32>}, {pipeline_mode = #tpu.pipeline_mode<synchronous>, transform_indices = @transform_1, window_bounds = array<i64: 32, 96>}, {pipeline_mode = #tpu.pipeline_mode<synchronous>, transform_indices = @transform_2, window_bounds = array<i64: 1, 96>}, {pipeline_mode = #tpu.pipeline_mode<synchronous>, transform_indices = @transform_3, window_bounds = array<i64: 8, 8>}, {pipeline_mode = #tpu.pipeline_mode<synchronous>, transform_indices = @transform_4, window_bounds = array<i64: 32, 32>}, {pipeline_mode = #tpu.pipeline_mode<synchronous>, transform_indices = @transform_5, window_bounds = array<i64: 1, 32>}, {transform_indices = @transform_6, window_bounds = array<i64: 2, 8, 32>}]} {
    %c0 = arith.constant 0 : index
    %c0_0 = arith.constant 0 : index
    %c0_1 = arith.constant 0 : index
    %0 = vector.load %arg1[%c0, %c0_0, %c0_1] : memref<2x8x32xf32, #tpu.memory_space<vmem>>, vector<2x8x32xf32>
    %1 = vector.shape_cast %0 : vector<2x8x32xf32> to vector<16x32xf32>
    %c0_2 = arith.constant 0 : index
    %c0_3 = arith.constant 0 : index
    %2 = vector.load %arg2[%c0_2, %c0_3] : memref<32x96xf32, #tpu.memory_space<vmem>>, vector<32x96xf32>
    %cst = arith.constant dense<0.000000e+00> : vector<16x96xf32>
    %3 = tpu.matmul %1, %2, %cst {dimension_numbers = #tpu.dot_dimension_numbers<[1], [0], [0], [1], [0, 0, 1, 1], [], []>} : vector<16x32xf32>, vector<32x96xf32>, vector<16x96xf32> -> vector<16x96xf32>
    %c0_4 = arith.constant 0 : index
    %c0_5 = arith.constant 0 : index
    %4 = vector.load %arg3[%c0_4, %c0_5] : memref<1x96xf32, #tpu.memory_space<vmem>>, vector<1x96xf32>
    %5 = vector.broadcast %4 : vector<1x96xf32> to vector<16x96xf32>
    %6 = arith.addf %3, %5 : vector<16x96xf32>
    %7 = vector.extract_strided_slice %6 {offsets = [0, 0], sizes = [16, 32], strides = [1, 1]} : vector<16x96xf32> to vector<16x32xf32>
    %8 = vector.extract_strided_slice %6 {offsets = [0, 32], sizes = [16, 32], strides = [1, 1]} : vector<16x96xf32> to vector<16x32xf32>
    %9 = vector.extract_strided_slice %6 {offsets = [0, 64], sizes = [16, 32], strides = [1, 1]} : vector<16x96xf32> to vector<16x32xf32>
    %cst_6 = arith.constant dense<0xFF800000> : vector<32xf32>
    %10 = vector.multi_reduction <maximumf>, %8, %cst_6 [0] : vector<16x32xf32> to vector<32xf32>
    %11 = vector.shape_cast %10 : vector<32xf32> to vector<1x32xf32>
    %12 = vector.broadcast %11 : vector<1x32xf32> to vector<16x32xf32>
    %13 = arith.subf %8, %12 : vector<16x32xf32>
    %14 = math.exp %13 : vector<16x32xf32>
    %15 = arith.mulf %14, %9 : vector<16x32xf32>
    %16 = tpu.concatenate %15, %14 in 1 : vector<16x32xf32>, vector<16x32xf32> -> vector<16x64xf32>
    %c0_7 = arith.constant 0 : index
    %c0_8 = arith.constant 0 : index
    %17 = vector.load %arg4[%c0_7, %c0_8] : memref<8x8xf32, #tpu.memory_space<vmem>>, vector<8x8xf32>
    %18 = vector.extract_strided_slice %16 {offsets = [0, 0], sizes = [8, 64], strides = [1, 1]} : vector<16x64xf32> to vector<8x64xf32>
    %cst_9 = arith.constant dense<0.000000e+00> : vector<8x64xf32>
    %19 = tpu.matmul %17, %18, %cst_9 {dimension_numbers = #tpu.dot_dimension_numbers<[1], [0], [0], [1], [0, 0, 1, 1], [], []>} : vector<8x8xf32>, vector<8x64xf32>, vector<8x64xf32> -> vector<8x64xf32>
    %20 = vector.extract_strided_slice %16 {offsets = [8, 0], sizes = [8, 64], strides = [1, 1]} : vector<16x64xf32> to vector<8x64xf32>
    %cst_10 = arith.constant dense<0.000000e+00> : vector<8x64xf32>
    %21 = tpu.matmul %17, %20, %cst_10 {dimension_numbers = #tpu.dot_dimension_numbers<[1], [0], [0], [1], [0, 0, 1, 1], [], []>} : vector<8x8xf32>, vector<8x64xf32>, vector<8x64xf32> -> vector<8x64xf32>
    %22 = tpu.concatenate %19, %21 in 0 : vector<8x64xf32>, vector<8x64xf32> -> vector<16x64xf32>
    %23 = vector.extract_strided_slice %22 {offsets = [0, 0], sizes = [16, 32], strides = [1, 1]} : vector<16x64xf32> to vector<16x32xf32>
    %24 = vector.extract_strided_slice %22 {offsets = [0, 32], sizes = [16, 32], strides = [1, 1]} : vector<16x64xf32> to vector<16x32xf32>
    %25 = arith.negf %7 : vector<16x32xf32>
    %26 = math.exp %25 : vector<16x32xf32>
    %cst_11 = arith.constant 1.000000e+00 : f32
    %27 = vector.broadcast %cst_11 : f32 to vector<16x32xf32>
    %28 = arith.addf %27, %26 : vector<16x32xf32>
    %29 = arith.divf %27, %28 : vector<16x32xf32>
    %30 = arith.mulf %29, %23 : vector<16x32xf32>
    %31 = tpu.reciprocal %24 {approx = true} : vector<16x32xf32> -> vector<16x32xf32>
    %32 = arith.mulf %30, %31 : vector<16x32xf32>
    %c0_12 = arith.constant 0 : index
    %c0_13 = arith.constant 0 : index
    %33 = vector.load %arg5[%c0_12, %c0_13] : memref<32x32xf32, #tpu.memory_space<vmem>>, vector<32x32xf32>
    %cst_14 = arith.constant dense<0.000000e+00> : vector<16x32xf32>
    %34 = tpu.matmul %32, %33, %cst_14 {dimension_numbers = #tpu.dot_dimension_numbers<[1], [0], [0], [1], [0, 0, 1, 1], [], []>} : vector<16x32xf32>, vector<32x32xf32>, vector<16x32xf32> -> vector<16x32xf32>
    %c0_15 = arith.constant 0 : index
    %c0_16 = arith.constant 0 : index
    %35 = vector.load %arg6[%c0_15, %c0_16] : memref<1x32xf32, #tpu.memory_space<vmem>>, vector<1x32xf32>
    %36 = vector.broadcast %35 : vector<1x32xf32> to vector<16x32xf32>
    %37 = arith.addf %34, %36 : vector<16x32xf32>
    %38 = vector.shape_cast %37 : vector<16x32xf32> to vector<2x8x32xf32>
    %c0_17 = arith.constant 0 : index
    %c0_18 = arith.constant 0 : index
    %c0_19 = arith.constant 0 : index
    %39 = vector.load %arg7[%c0_17, %c0_18, %c0_19] : memref<2x8x32xf32, #tpu.memory_space<vmem>>, vector<2x8x32xf32>
    tpu.vector_store %arg7[%c0_17, %c0_18, %c0_19], %38 {strides = array<i32>} : memref<2x8x32xf32, #tpu.memory_space<vmem>>, vector<2x8x32xf32>,
    return
  }
  func.func @transform_0(%arg0: i32) -> (i32, i32, i32) {
    %c0_i32 = arith.constant 0 : i32
    %c0_i32_0 = arith.constant 0 : i32
    %c0_i32_1 = arith.constant 0 : i32
    return %arg0, %c0_i32, %c0_i32_0 : i32, i32, i32
  }
  func.func @transform_1(%arg0: i32) -> (i32, i32) {
    %c0_i32 = arith.constant 0 : i32
    %c0_i32_0 = arith.constant 0 : i32
    %c0_i32_1 = arith.constant 0 : i32
    return %c0_i32, %c0_i32_0 : i32, i32
  }
  func.func @transform_2(%arg0: i32) -> (i32, i32) {
    %c0_i32 = arith.constant 0 : i32
    %c0_i32_0 = arith.constant 0 : i32
    %c0_i32_1 = arith.constant 0 : i32
    return %c0_i32, %c0_i32_0 : i32, i32
  }
  func.func @transform_3(%arg0: i32) -> (i32, i32) {
    %c0_i32 = arith.constant 0 : i32
    %c0_i32_0 = arith.constant 0 : i32
    %c0_i32_1 = arith.constant 0 : i32
    return %c0_i32, %c0_i32_0 : i32, i32
  }
  func.func @transform_4(%arg0: i32) -> (i32, i32) {
    %c0_i32 = arith.constant 0 : i32
    %c0_i32_0 = arith.constant 0 : i32
    %c0_i32_1 = arith.constant 0 : i32
    return %c0_i32, %c0_i32_0 : i32, i32
  }
  func.func @transform_5(%arg0: i32) -> (i32, i32) {
    %c0_i32 = arith.constant 0 : i32
    %c0_i32_0 = arith.constant 0 : i32
    %c0_i32_1 = arith.constant 0 : i32
    return %c0_i32, %c0_i32_0 : i32, i32
  }
  func.func @transform_6(%arg0: i32) -> (i32, i32, i32) {
    %c0_i32 = arith.constant 0 : i32
    %c0_i32_0 = arith.constant 0 : i32
    %c0_i32_1 = arith.constant 0 : i32
    return %arg0, %c0_i32, %c0_i32_0 : i32, i32, i32
  }
}

</mosaic_0001>

<bundles_post_ra>
// kernel: tpu_custom_call.1
= control target key start
LH: loop header
LB: loop body
LE: loop exit
PB: predicated region body
PF: predicated region fallthrough
CT: control target
= control target key end

     0   :  { %11 = vsyncpa [#allocation3], 0  ;;  %s776_s0 = inlined_call_operand.hbm [shape: f32[2,8,32], index: 0, kind: input, shape index: {}]   ;;  %s777_s1 = inlined_call_operand.hbm [shape: f32[32,96], index: 1, kind: input, shape index: {}]   ;;  %s778_s2 = inlined_call_operand.vmem [shape: f32[1,96], index: 2, kind: input, shape index: {}]   ;;  %s779_s3 = inlined_call_operand.hbm [shape: f32[8,8], index: 3, kind: input, shape index: {}]   ;;  %s780_s4 = inlined_call_operand.hbm [shape: f32[32,32], index: 4, kind: input, shape index: {}]   ;;  %s781_s5 = inlined_call_operand.vmem [shape: f32[1,32], index: 5, kind: input, shape index: {}]   ;;  %s782_s6 = inlined_call_operand.hbm [shape: f32[2,8,32], index: 6, kind: output, shape index: {}]  }
   0x1   :  { %12 = vsyncpa [#allocation6], 0 }
   0x2   :  { %13 = vsyncpa [#allocation9], 0 }
   0x3   :  { %14 = vsyncpa [#allocation4], 0  ;;  %s684_s21 = smov [#allocation5]   ;;  %s685_s23 = smov [#allocation2]  }
   0x4   :  { %s32_s22 = sshll.u32 %s684_s21, 4  ;;  %s20_s24 = sshll.u32 %s685_s23, 4  ;;  %s33_s22 = int_to_ptr.vmem [resolvable:$true] %s32_s22  ;;  %s21_s24 = int_to_ptr.vmem [resolvable:$true] %s20_s24 }
   0x5   :  { %s584_s25 = scalar_lea.vmem %s33_s22, 512  ;;  %p589_p1 = scmp.lt.s32.totalorder %s33_s22, %s33_s22 }
   0x6   :  { %p585_p0 = scmp.ne.s32.totalorder %s33_s22, %s584_s25  ;;  %p590_p2 = scmp.lt.s32.totalorder %s584_s25, %s584_s25 }
   0x8   :  { %p591_p3 = por %p590_p2, %p589_p1 }
   0xa   :  { %p592_p4 = pnand %p591_p3, %p585_p0 }
   0xc   :  { %595 = shalt.err (!%p592_p4)
}
   0xd   :  { %s686_s26 = smov 128   ;;  %s687_s27 = smov 8  }
   0xe   :  { %38 = dma.hbm_to_vmem [thread:$0]  %s777_s1, 512, %s33_s22, [#allocation6], %s686_s26, %s686_s26, %s687_s27  }
   0xf   :  { %s604_s30 = scalar_lea.vmem %s21_s24, 256  ;;  %p609_p6 = scmp.lt.s32.totalorder %s21_s24, %s21_s24 }
  0x10   :  { %p605_p5 = scmp.ne.s32.totalorder %s21_s24, %s604_s30  ;;  %p610_p7 = scmp.lt.s32.totalorder %s604_s30, %s604_s30 }
  0x12   :  { %p611_p8 = por %p610_p7, %p609_p6 }
  0x14   :  { %p612_p9 = pnand %p611_p8, %p605_p5 }
  0x16   :  { %615 = shalt.err (!%p612_p9)
}
  0x17   :  { %26 = dma.hbm_to_vmem [thread:$0]  %s776_s0, 256, %s21_s24, [#allocation3], %s686_s26, %s686_s26, %s687_s27  }
  0x18   :  { %s688_s9 = smov [#allocation7]   ;;  %s689_s11 = smov [#allocation8]  }
  0x19   :  { %s47_s10 = sshll.u32 %s688_s9, 4  ;;  %s56_s12 = sshll.u32 %s689_s11, 4  ;;  %s48_s10 = int_to_ptr.vmem [resolvable:$true] %s47_s10  ;;  %s57_s12 = int_to_ptr.vmem [resolvable:$true] %s56_s12 }
  0x1a   :  { %s624_s1 = scalar_lea.vmem %s48_s10, 128  ;;  %p629_p11 = scmp.lt.s32.totalorder %s48_s10, %s48_s10 }
  0x1b   :  { %p625_p10 = scmp.ne.s32.totalorder %s48_s10, %s624_s1  ;;  %p630_p12 = scmp.lt.s32.totalorder %s624_s1, %s624_s1 }
  0x1d   :  { %p631_p13 = por %p630_p12, %p629_p11 }
  0x1f   :  { %p632_p0 = pnand %p631_p13, %p625_p10 }
  0x21   :  { %635 = shalt.err (!%p632_p0)
}
  0x22   :  { %50 = dma.hbm_to_vmem [thread:$0]  %s779_s3, 128, %s48_s10, [#allocation6]  }
  0x23   :  { %s644_s15 = scalar_lea.vmem %s57_s12, 512  ;;  %p649_p2 = scmp.lt.s32.totalorder %s57_s12, %s57_s12 }
  0x24   :  { %p645_p1 = scmp.ne.s32.totalorder %s57_s12, %s644_s15  ;;  %p650_p3 = scmp.lt.s32.totalorder %s644_s15, %s644_s15 }
  0x26   :  { %p651_p4 = por %p650_p3, %p649_p2 }
  0x28   :  { %p652_p5 = pnand %p651_p4, %p645_p1 }
  0x2a   :  { %655 = shalt.err (!%p652_p5)
}
  0x2b   :  { %62 = dma.hbm_to_vmem [thread:$0]  %s780_s4, 512, %s57_s12, [#allocation9], %s686_s26, %s686_s26, %s687_s27  }
  0x2c   :  { %676 = dma.done.wait [#allocation3], 256  }
  0x2d   :  { %677 = vsyncadd [#allocation3], 4294967040 }
  0x2e   :  { %678 = dma.done.wait [#allocation6], 640  }
  0x2f   :  { %679 = vsyncadd [#allocation6], 4294966656 }
  0x30   :  { %680 = dma.done.wait [#allocation9], 512  }
  0x31   :  { %681 = vsyncadd [#allocation9], 4294966784  ;;  %vm90_vm0 = vcmask 261120   ;;  %v82_v0 = vld [vmem:[#allocation5 + $0x18] sm:$0xff]  ;;  %v81_v1 = vld [vmem:[#allocation5 + $0x10] sm:$0xff]  ;;  %vm172_vm1 = vcmask 523520  }
  0x32   :  { %518 = vmatprep.subr.mxu0 %v82_v0  ;;  %v77_v2 = vld [vmem:[#allocation2] sm:$0xff]  ;;  %v80_v3 = vld [vmem:[#allocation5 + $0x8] sm:$0xff]  ;;  %v79_v4 = vld [vmem:[#allocation5] sm:$0xff]  ;;  %s690_s17 = smov 96   ;;  %v691_v24 = vmov 0.0   ;;  %vm692_vm2 = vmmov 0  }
  0x33   :  { %519 = vmatpush3.msra.mxu0 %v82_v0  ;;  %526 = vmatprep.mubr.msk.f32.mxu0 %vm90_vm0, %v77_v2  ;;  %v78_v5 = vld [vmem:[#allocation2 + $0x8] sm:$0xff]  ;;  %v492_v6 = vld [vmem:[%s778_s2] ss:$0 sm:$0xff]  ;;  %v208_v32 = vld [vmem:[#allocation7] sm:$0xff]  ;;  %vm209_vm3 = vcmask 64512   ;;  %s693_s19 = smov [#allocation10]  }
  0x34   :  { %520 = vmatprep.subr.mxu0 %v81_v1  ;;  %534 = vmatprep.subr.mxu1 %v691_v24  ;;  %v382_v36 = vld [vmem:[#allocation8 + $0x18] sm:$0xff]  ;;  %v381_v47 = vld [vmem:[#allocation8 + $0x10] sm:$0xff]  ;;  %v380_v48 = vld [vmem:[#allocation8 + $0x8] sm:$0xff]  ;;  %s478_s20 = sshll.u32 %s693_s19, 4  ;;  %s479_s20 = int_to_ptr.vmem [resolvable:$true] %s478_s20 }
  0x35   :  { %521 = vmatpush3.msra.mxu0 %v81_v1  ;;  %536 = vmatprep.mubr.msk.f32.mxu1 %vm692_vm2, %v691_v24  ;;  %v379_v53 = vld [vmem:[#allocation8] sm:$0xff]  ;;  %v499_v60 = vld [vmem:[%s781_s5] ss:$0 sm:$0xff]  ;;  %s656_s21 = scalar_lea.vmem %s479_s20, 256  ;;  %p661_p7 = scmp.lt.s32.totalorder %s479_s20, %s479_s20 }
  0x36   :  { %522 = vmatprep.subr.mxu0 %v80_v3  ;;  %p657_p6 = scmp.ne.s32.totalorder %s479_s20, %s656_s21  ;;  %p662_p8 = scmp.lt.s32.totalorder %s656_s21, %s656_s21 }
  0x37   :  { %523 = vmatpush3.msra.mxu0 %v80_v3 }
  0x38   :  { %524 = vmatprep.subr.mxu0 %v79_v4  ;;  %p663_p9 = por %p662_p8, %p661_p7 }
  0x39   :  { %525 = vmatpush3.msra.mxu0 %v79_v4 }
  0x3a   :  { %527 = vmatmul.mubr.msk.f32.vlgmr.msra.gmra.mxu0 %vm90_vm0, %v78_v5  ;;  %529 = vmatprep.subr.mxu0 %v691_v24  ;;  %p664_p10 = pnand %p663_p9, %p657_p6 }
  0x3b   :  { %531 = vmatprep.mubr.msk.f32.mxu0 %vm692_vm2, %v691_v24 }
  0xfa   :  { %v528_v7 = vpop.f32.mrf.mxu0 }
  0xfb   :  { %v169_v8 = vadd.f32 %v528_v7, %v492_v6 }
  0xfc   :  { %v163_v9 = vpop.f32.mrf.mxu0 }
  0xfd   :  { %v164_v10 = vadd.f32 %v492_v6, %v163_v9  ;;  %v174_v11 = vsel %vm172_vm1, %v169_v8, -inf  ;;  %v498_v38 = vmul.f32 -1.442695, %v169_v8 }
  0xff   :  { %v173_v12 = vsel %vm172_vm1, %v164_v10, -inf  ;;  %190 = vrot.lane.b32.xlu0 %v164_v10, %s690_s17  ;;  %v497_v37 = vmul.f32 -1.442695, %v164_v10 }
 0x100   :  { %v175_v13 = vmax.f32 %v173_v12, %v174_v11 }
 0x102   :  { %v176_v14 = vrot.slane %v175_v13, 4 }
 0x103   :  { %192 = vrot.lane.b32.xlu0 %v169_v8, %s690_s17 }
 0x104   :  { %v177_v15 = vmax.f32 %v175_v13, %v176_v14 }
 0x106   :  { %v178_v16 = vrot.slane %v177_v15, 2 }
 0x108   :  { %v179_v17 = vmax.f32 %v177_v15, %v178_v16 }
 0x10a   :  { %v180_v18 = vrot.slane %v179_v17, 1 }
 0x10c   :  { %v181_v19 = vmax.f32 %v179_v17, %v180_v18 }
 0x10e   :  { %v182_v20 = vsub.f32 %v164_v10, %v181_v19  ;;  %v183_v21 = vsub.f32 %v169_v8, %v181_v19 }
 0x110   :  { %v184_v22 = vmul.f32 1.442695, %v182_v20  ;;  %v186_v23 = vmul.f32 1.442695, %v183_v21 }
 0x112   :  { %560 = vpow2.f32 %v184_v22 }
 0x113   :  { %562 = vpow2.f32 %v186_v23 }
 0x114   :  { %564 = vpow2.f32 %v497_v37 }
 0x115   :  { %566 = vpow2.f32 %v498_v38 }
 0x11f   :  { %v561_v25 = vpop.eup %560 }
 0x120   :  { %v563_v28 = vpop.eup %562 }
 0x121   :  { %v565_v39 = vpop.eup %564 }
 0x122   :  { %v359_v40 = vadd.f32 1.0, %v565_v39  ;;  %v567_v41 = vpop.eup %566 }
 0x123   :  { %v360_v42 = vadd.f32 1.0, %v567_v41 }
 0x124   :  { %568 = vrcp.f32 %v359_v40 }
 0x125   :  { %570 = vrcp.f32 %v360_v42 }
 0x131   :  { %v569_v43 = vpop.eup %568 }
 0x132   :  { %v571_v49 = vpop.eup %570 }
 0x171   :  { %v191_v26 = vpop.permute.xlu0 %190 }
 0x172   :  { %v196_v27 = vmul.f32 %v561_v25, %v191_v26 }
 0x174   :  { %200 = vrot.lane.b32.xlu1 %v196_v27, %s690_s17 }
 0x175   :  { %v193_v29 = vpop.permute.xlu0 %192 }
 0x176   :  { %v197_v30 = vmul.f32 %v563_v28, %v193_v29 }
 0x178   :  { %202 = vrot.lane.b32.xlu1 %v197_v30, %s690_s17 }
 0x1e6   :  { %v201_v31 = vpop.permute.xlu1 %200 }
 0x1e7   :  { %v206_v33 = vsel %vm90_vm0, %v201_v31, %v561_v25 }
 0x1e8   :  { %530 = vmatpush3.msra.mxu0 %v206_v33 }
 0x1e9   :  { %532 = vmatmul.mubr.msk.f32.vlgmr.msra.gmra.mxu0 %vm209_vm3, %v208_v32 }
 0x1ea   :  { %v203_v34 = vpop.permute.xlu1 %202 }
 0x1eb   :  { %v207_v35 = vsel %vm90_vm0, %v203_v34, %v563_v28 }
 0x1ec   :  { %535 = vmatpush3.msra.mxu1 %v207_v35 }
 0x1ed   :  { %537 = vmatmul.mubr.msk.f32.vlgmr.msra.gmra.mxu1 %vm209_vm3, %v208_v32  ;;  %539 = vmatprep.subr.mxu1 %v382_v36 }
 0x1ee   :  { %540 = vmatpush3.msra.mxu1 %v382_v36 }
 0x1ef   :  { %541 = vmatprep.subr.mxu1 %v381_v47 }
 0x1f0   :  { %542 = vmatpush3.msra.mxu1 %v381_v47 }
 0x1f1   :  { %543 = vmatprep.subr.mxu1 %v380_v48 }
 0x1f2   :  { %544 = vmatpush3.msra.mxu1 %v380_v48 }
 0x1f3   :  { %545 = vmatprep.subr.mxu1 %v379_v53 }
 0x1f4   :  { %546 = vmatpush3.msra.mxu1 %v379_v53 }
 0x2a9   :  { %v279_v44 = vpop.f32.mrf.mxu0 }
 0x2aa   :  { %v365_v45 = vmul.f32 %v569_v43, %v279_v44  ;;  %572 = vrcp.f32 %v279_v44 }
 0x2ab   :  { %v533_v46 = vpop.f32.mrf.mxu0 }
 0x2ad   :  { %v349_v50 = vpop.f32.mrf.mxu1 }
 0x2ae   :  { %v366_v51 = vmul.f32 %v571_v49, %v349_v50  ;;  %574 = vrcp.f32 %v349_v50 }
 0x2af   :  { %v538_v52 = vpop.f32.mrf.mxu1 }
 0x2b7   :  { %v573_v54 = vpop.eup %572 }
 0x2b8   :  { %371 = vrot.lane.b32.xlu0 %v573_v54, %s690_s17 }
 0x2bb   :  { %v575_v55 = vpop.eup %574 }
 0x2bc   :  { %373 = vrot.lane.b32.xlu1 %v575_v55, %s690_s17 }
 0x32a   :  { %v372_v56 = vpop.permute.xlu0 %371 }
 0x32b   :  { %v377_v57 = vmul.f32 %v372_v56, %v365_v45 }
 0x32d   :  { %547 = vmatprep.mubr.msk.f32.mxu1 %vm90_vm0, %v377_v57 }
 0x32e   :  { %v374_v58 = vpop.permute.xlu1 %373 }
 0x32f   :  { %v378_v59 = vmul.f32 %v374_v58, %v366_v51 }
 0x331   :  { %548 = vmatmul.mubr.msk.f32.vlgmr.msra.gmra.mxu1 %vm90_vm0, %v378_v59 }
 0x3f1   :  { %v549_v61 = vpop.f32.mrf.mxu1 }
 0x3f2   :  { %v468_v62 = vadd.f32 %v549_v61, %v499_v60 }
 0x3f3   :  { %v462_v63 = vpop.f32.mrf.mxu1 }
 0x3f4   :  { %472 = vst.msk [vmem:[#allocation10 + $0x8] sm:$0xff] %vm90_vm0, %v468_v62  ;;  %v463_v0 = vadd.f32 %v499_v60, %v462_v63 }
 0x3f6   :  { %471 = vst.msk [vmem:[#allocation10] sm:$0xff] %vm90_vm0, %v463_v0 }
 0x3f7   :  { %667 = shalt.err (!%p664_p10)
}
 0x3f8   :  { %484 = dma.vmem_to_hbm [thread:$0]  %s479_s20, 256, %s782_s6, [#allocation4], %s686_s26, %s686_s26, %s687_s27  }
 0x3f9   :  { %682 = dma.done.wait [#allocation4], 256  }
 0x3fa   :  { %683 = vsyncadd [#allocation4], 4294967040 }
 0x3fb   :  { %488 = vsyncpa [#allocation3], 1 }
 0x3fc   :  { %489 = vsyncpa [#allocation6], 1 }
 0x3fd   :  { %490 = vsyncpa [#allocation9], 1 }
 0x3fe   :  { %491 = vsyncpa [#allocation4], 1 }

</bundles_post_ra>
